<compile_context>
chip_gen: v5e
topology: v5e:2x2
jax: 0.10.0
libtpu: 0.0.40
codegen_flags: <defaults>
</compile_context>

<pallas_src>
import jax
import jax.numpy as jnp
from jax.experimental import pallas as pl
from jax.experimental.pallas import tpu as pltpu


def _embed_kernel(p_ref, w_ref, pe_ref, o_ref):
    # p_ref : (1, M, K) bf16  -- row 0 is a zero patch, rows 1..N are patches
    # w_ref : (K, te)  bf16   -- flattened conv weight tile
    # pe_ref: (M, te)  f32    -- row 0 = cls+pos[0]; rows 1.. = pos[1:]+bias
    # o_ref : (1, M, te)
    proj = jnp.dot(p_ref[0], w_ref[...], preferred_element_type=jnp.float32)
    o_ref[0, :, :] = (proj + pe_ref[...]).astype(o_ref.dtype)


def _round_up(v, m):
    return (v + m - 1) // m * m


def vit_patch_embedding(x, weight, bias, cls_token, pos_embed, *, patch_size):
    """Forward pass of VanillaViTPatchEmbedding.

    x:         (B, C, H, W)    NCHW (PyTorch convention)
    weight:    (E, C, ph, pw)  conv weight (PyTorch OIHW layout)
    bias:      (E,)
    cls_token: (1, 1, E)
    pos_embed: (1, N+1, E)
    returns:   (B, N+1, E) in x.dtype
    """
    B, C, H, W = x.shape
    ph, pw = patch_size
    assert H % ph == 0 and W % pw == 0, "image size must be divisible by patch size"
    gh, gw = H // ph, W // pw
    N = gh * gw
    M = N + 1
    E = weight.shape[0]
    K = C * ph * pw
    assert pos_embed.shape == (1, M, E)
    out_dtype = x.dtype

    # ---- embedding-dim padding & tile selection (all static) ----------------
    E_pad = _round_up(E, 128)
    # Resident operands: W (bf16) + pe table (f32). Keep the whole embedding
    # dim resident unless it would blow a conservative VMEM budget.
    resident_bytes = 2 * K * E_pad + 4 * M * E_pad
    if resident_bytes <= 8 * 1024 * 1024:
        te = E_pad
    elif E_pad % 256 == 0:
        te = 256
    else:
        te = 128
    # v7x: give both TensorCores work for single-image calls (harmless on 1-TC
    # chips: one extra fetch of the small per-image patch block).
    if B == 1 and te == E_pad and E_pad % 256 == 0:
        te = E_pad // 2
    ne = E_pad // te

    # ---- parameter prep (tiny, wrapper-side) --------------------------------
    # Flattened conv weight; K ordered (c, pi, pj) to match the patch layout.
    w_flat = weight.reshape(E, K).T.astype(jnp.bfloat16)                   # (K, E)
    # Additive table: row 0 = cls + pos_embed[0]; rows 1.. = pos_embed[1:]+bias.
    pe_rows = jnp.concatenate(
        [cls_token[0] + pos_embed[0, 0:1, :],
         pos_embed[0, 1:, :] + bias[None, :]], axis=0).astype(jnp.float32)  # (M, E)
    if E_pad != E:
        w_flat = jnp.pad(w_flat, ((0, 0), (0, E_pad - E)))
        pe_rows = jnp.pad(pe_rows, ((0, 0), (0, E_pad - E)))

    # ---- patch extraction in the wrapper (fuses with the bf16 cast) ---------
    patches = x.astype(jnp.bfloat16).reshape(B, C, gh, ph, gw, pw)
    patches = patches.transpose(0, 2, 4, 1, 3, 5).reshape(B, N, K)
    # Prepend a zero patch row per image -> kernel emits one aligned store.
    patches = jnp.pad(patches, ((0, 0), (1, 0), (0, 0)))                    # (B, M, K)

    # ---- specs / grid --------------------------------------------------------
    out_shape = jax.ShapeDtypeStruct((B, M, E_pad), out_dtype)
    if ne == 1:
        grid = (B,)
        in_specs = [
            pl.BlockSpec((1, M, K), lambda b: (b, 0, 0)),
            pl.BlockSpec((K, te), lambda b: (0, 0)),
            pl.BlockSpec((M, te), lambda b: (0, 0)),
        ]
        out_spec = pl.BlockSpec((1, M, te), lambda b: (b, 0, 0))
        sem = ("parallel",)
    else:
        # e is the SLOW axis: W/pe tiles are fetched once per e-tile; only the
        # (smaller) per-image patch block is re-fetched across e.
        grid = (ne, B)
        in_specs = [
            pl.BlockSpec((1, M, K), lambda e, b: (b, 0, 0)),
            pl.BlockSpec((K, te), lambda e, b: (0, e)),
            pl.BlockSpec((M, te), lambda e, b: (0, e)),
        ]
        out_spec = pl.BlockSpec((1, M, te), lambda e, b: (b, 0, e))
        sem = ("parallel", "parallel")

    out = pl.pallas_call(
        _embed_kernel,
        out_shape=out_shape,
        grid=grid,
        in_specs=in_specs,
        out_specs=out_spec,
        compiler_params=pltpu.CompilerParams(dimension_semantics=sem),
    )(patches, w_flat, pe_rows)

    if E_pad != E:
        # Only fires for embedding dims that are not 128-aligned (toy configs);
        # production ViT widths (768/1024/1280) skip this extra output pass.
        out = out[..., :E]
    return out


if __name__ == "__main__":
    # Small config: img_size=16, patch_size=4, in_chans=4, embed_dim=32, B=2.
    img_size = 16
    patch = (4, 4)
    in_chans = 4
    embed_dim = 32
    B = 2
    num_patches = (img_size // patch[0]) * (img_size // patch[1])   # 16

    key = jax.random.PRNGKey(0)
    kx, kw, kb, kc, kp = jax.random.split(key, 5)

    x = jax.random.normal(kx, (B, in_chans, img_size, img_size), dtype=jnp.float32)
    # PyTorch inits cls/pos to zeros; use random values so all paths are
    # exercised non-trivially.
    weight = jax.random.normal(
        kw, (embed_dim, in_chans, patch[0], patch[1]), jnp.float32) * 0.02
    bias = jax.random.normal(kb, (embed_dim,), jnp.float32) * 0.02
    cls_token = jax.random.normal(kc, (1, 1, embed_dim), jnp.float32) * 0.02
    pos_embed = jax.random.normal(
        kp, (num_patches + 1, embed_dim), jnp.float32)[None] * 0.02

    fn = jax.jit(vit_patch_embedding, static_argnames=("patch_size",))
    out = fn(x, weight, bias, cls_token, pos_embed, patch_size=patch)
    out = jax.block_until_ready(out)

    # Reference in plain f32 JAX (conv via lax.conv_general_dilated).
    ref_conv = jax.lax.conv_general_dilated(
        x, weight, window_strides=patch, padding="VALID",
        dimension_numbers=("NCHW", "OIHW", "NCHW"))
    ref_conv = ref_conv + bias[None, :, None, None]
    ref_tok = ref_conv.reshape(B, embed_dim, num_patches).transpose(0, 2, 1)
    ref_cls = jnp.broadcast_to(cls_token, (B, 1, embed_dim))
    ref = jnp.concatenate([ref_cls, ref_tok], axis=1) + pos_embed

    assert out.shape == (B, num_patches + 1, embed_dim), out.shape
    assert out.dtype == x.dtype, out.dtype
    # bf16 matmul operands vs. f32 reference -> loose tolerance.
    err = float(jnp.max(jnp.abs(out.astype(jnp.float32) - ref)))
    assert jnp.allclose(out.astype(jnp.float32), ref, atol=2e-2, rtol=2e-2), err

    print("KERNEL_OK")
</pallas_src>

<mosaic_0001>
module attributes {stable_mosaic.version = 11 : i64} {
  func.func @_embed_kernel(%arg0: i32, %arg1: memref<1x17x64xbf16, #tpu.memory_space<vmem>>, %arg2: memref<64x128xbf16, #tpu.memory_space<vmem>>, %arg3: memref<17x128xf32, #tpu.memory_space<vmem>>, %arg4: memref<1x17x128xf32, #tpu.memory_space<vmem>>) attributes {dimension_semantics = [#tpu.dimension_semantics<parallel>], iteration_bounds = array<i64: 2>, scalar_prefetch = 0 : i64, scratch_operands = 0 : i64, tpu.core_type = #tpu.core_type<tc>, window_params = [{transform_indices = @transform_0, window_bounds = array<i64: 1, 17, 64>}, {pipeline_mode = #tpu.pipeline_mode<synchronous>, transform_indices = @transform_1, window_bounds = array<i64: 64, 128>}, {pipeline_mode = #tpu.pipeline_mode<synchronous>, transform_indices = @transform_2, window_bounds = array<i64: 17, 128>}, {transform_indices = @transform_3, window_bounds = array<i64: 1, 17, 128>}]} {
    %c0 = arith.constant 0 : index
    %c0_0 = arith.constant 0 : index
    %c0_1 = arith.constant 0 : index
    %0 = vector.load %arg1[%c0, %c0_0, %c0_1] : memref<1x17x64xbf16, #tpu.memory_space<vmem>>, vector<1x17x64xbf16>
    %1 = vector.shape_cast %0 : vector<1x17x64xbf16> to vector<17x64xbf16>
    %c0_2 = arith.constant 0 : index
    %c0_3 = arith.constant 0 : index
    %2 = vector.load %arg2[%c0_2, %c0_3] : memref<64x128xbf16, #tpu.memory_space<vmem>>, vector<64x128xbf16>
    %cst = arith.constant dense<0.000000e+00> : vector<17x128xf32>
    %3 = tpu.matmul %1, %2, %cst {dimension_numbers = #tpu.dot_dimension_numbers<[1], [0], [0], [1], [0, 0, 1, 1], [], []>} : vector<17x64xbf16>, vector<64x128xbf16>, vector<17x128xf32> -> vector<17x128xf32>
    %c0_4 = arith.constant 0 : index
    %c0_5 = arith.constant 0 : index
    %4 = vector.load %arg3[%c0_4, %c0_5] : memref<17x128xf32, #tpu.memory_space<vmem>>, vector<17x128xf32>
    %5 = arith.addf %3, %4 : vector<17x128xf32>
    %c0_6 = arith.constant 0 : index
    %c0_7 = arith.constant 0 : index
    %c0_8 = arith.constant 0 : index
    %6 = vector.load %arg4[%c0_6, %c0_7, %c0_8] : memref<1x17x128xf32, #tpu.memory_space<vmem>>, vector<1x17x128xf32>
    %7 = vector.shape_cast %6 : vector<1x17x128xf32> to vector<17x128xf32>
    %8 = vector.shape_cast %5 : vector<17x128xf32> to vector<1x17x128xf32>
    tpu.vector_store %arg4[%c0_6, %c0_7, %c0_8], %8 {strides = array<i32>} : memref<1x17x128xf32, #tpu.memory_space<vmem>>, vector<1x17x128xf32>,
    return
  }
  func.func @transform_0(%arg0: i32) -> (i32, i32, i32) {
    %c0_i32 = arith.constant 0 : i32
    %c0_i32_0 = arith.constant 0 : i32
    %c0_i32_1 = arith.constant 0 : i32
    return %arg0, %c0_i32, %c0_i32_0 : i32, i32, i32
  }
  func.func @transform_1(%arg0: i32) -> (i32, i32) {
    %c0_i32 = arith.constant 0 : i32
    %c0_i32_0 = arith.constant 0 : i32
    %c0_i32_1 = arith.constant 0 : i32
    return %c0_i32, %c0_i32_0 : i32, i32
  }
  func.func @transform_2(%arg0: i32) -> (i32, i32) {
    %c0_i32 = arith.constant 0 : i32
    %c0_i32_0 = arith.constant 0 : i32
    %c0_i32_1 = arith.constant 0 : i32
    return %c0_i32, %c0_i32_0 : i32, i32
  }
  func.func @transform_3(%arg0: i32) -> (i32, i32, i32) {
    %c0_i32 = arith.constant 0 : i32
    %c0_i32_0 = arith.constant 0 : i32
    %c0_i32_1 = arith.constant 0 : i32
    return %arg0, %c0_i32, %c0_i32_0 : i32, i32, i32
  }
}

</mosaic_0001>

<bundles_post_ra>
// kernel: vit_patch_embedding.1
= control target key start
LH: loop header
LB: loop body
LE: loop exit
PB: predicated region body
PF: predicated region fallthrough
CT: control target
= control target key end

     0   :  { %s379_s12 = smov 0   ;;  %s417_s0 = inlined_call_operand.vmem [shape: bf16[2,17,64], index: 0, kind: input, shape index: {}]   ;;  %s418_s1 = inlined_call_operand.vmem [shape: bf16[64,128], index: 1, kind: input, shape index: {}]   ;;  %s419_s2 = inlined_call_operand.vmem [shape: f32[17,128], index: 2, kind: input, shape index: {}]   ;;  %s420_s3 = inlined_call_operand.vmem [shape: f32[2,17,128], index: 3, kind: output, shape index: {}]  }
   0x1 LB: > { %s301_s13 = sadd.s32 4294967295, %s357_s12   ;;  %p305_p0 = scmp.ge.s32.totalorder %s357_s12, 1  ;;  %s357_s12 = sphi %s379_s12, %s13_s12  }
   0x2   : > { %p137_p1 = scmp.lt.s32.totalorder %s357_s12, 3 }
   0x4   : > { %p138_p2 = pnand %p305_p0, %p137_p1 }
   0x5   : > { %p161_p3 = scmp.lt.s32.totalorder (!%p138_p2), %s301_s13, 1 }
   0x6   : > { %141 = sbr.rel (%p138_p2) target bundleno = 164 (0xa4), region = 32 }
   0xb   : > { %v336_v0 = vld [vmem:[%s418_s1 + $0x18] sm:$0xff]  ;;  %v335_v1 = vld [vmem:[%s418_s1 + $0x10] sm:$0xff]  ;;  %s422_s13 = smov (!%p161_p3, %s301_s13), 1  ;;  %v334_v2 = vld [vmem:[%s418_s1 + $0x8] sm:$0xff]  ;;  %vm218_vm0 = vcmask 523264  }
   0xc   : > { %229 = vmatpush.bf16.msra.mxu0 %v336_v0  ;;  %337 = vmatpush.bf16.msra.mxu1 %v336_v0  ;;  %s341_s18 = smul.u32 12, %s422_s13  ;;  %v333_v5 = vld [vmem:[%s418_s1] sm:$0xff]  ;;  %v185_v9 = vld [vmem:[%s419_s2 + $0x10] sm:$0x1]  ;;  %v184_v14 = vld [vmem:[%s419_s2 + $0x8] sm:$0xff] }
   0xd   : > { %s342_s26 = smul.u32 24, %s422_s13  ;;  %v183_v8 = vld [vmem:[%s419_s2] sm:$0xff] }
   0xe   : > { %s165_s23 = scalar_lea.vmem %s417_s0, %s341_s18 }
   0xf   : > { %v174_v3 = vld [vmem:[%s165_s23 + $0x8] sm:$0x1]  ;;  %v332_v6 = vld [vmem:[%s165_s23] sm:$0xff]  ;;  %s170_s6 = scalar_lea.vmem %s420_s3, %s342_s26 }
  0x10   : > { %230 = vmatpush.bf16.msra.mxu0 %v335_v1  ;;  %338 = vmatpush.bf16.msra.mxu1 %v335_v1  ;;  %v191_v4 = vunpack.c.l.b16 %v174_v3 }
  0x12   : > { %v193_v7 = vpack.c.b16 %v191_v4, %v191_v4 }
  0x14   : > { %231 = vmatpush.bf16.msra.mxu0 %v334_v2  ;;  %339 = vmatpush.bf16.msra.mxu1 %v334_v2 }
  0x18   : > { %232 = vmatpush.bf16.msra.mxu0 %v333_v5  ;;  %340 = vmatpush.bf16.msra.mxu1 %v333_v5 }
  0x1b   : > { %328 = vmatmul.msk.bf16.vlgmr.msra.gmra.mxu0 %vm218_vm0, %v332_v6  ;;  %329 = vmatmul.msk.bf16.vlgmr.msra.gmra.mxu1 %vm218_vm0, %v193_v7 }
  0x98   : > { %v234_v10 = vpop.f32.mrf.mxu0  ;;  %v239_v11 = vpop.f32.mrf.mxu1 }
  0x99   : > { %v235_v12 = vadd.f32 %v234_v10, %v183_v8  ;;  %v240_v13 = vadd.f32 %v239_v11, %v185_v9 }
  0x9b   : > { %243 = vst [vmem:[%s170_s6] sm:$0xff] %v235_v12 }
  0x9c   : > { %245 = vst [vmem:[%s170_s6 + $0x10] sm:$0x1] %v240_v13 }
  0xa0   : > { %v236_v15 = vpop.f32.mrf.mxu0  ;;  %v241_v16 = vpop.f32.mrf.mxu1 }
  0xa1   : > { %v237_v17 = vadd.f32 %v236_v15, %v184_v14 }
  0xa3   : > { %244 = vst [vmem:[%s170_s6 + $0x8] sm:$0xff] %v237_v17 }
  0xa4 PF: > { %s13_s12 = sadd.s32 1, %s357_s12  }
  0xa5   : > { %p10_p4 = scmp.ge.s32.totalorder %s13_s12, 4  }
  0xa7   :  { %12 = sbr.rel (!%p10_p4) target bundleno = 1 (0x1), region = 62 }

</bundles_post_ra>
